<compile_context>
chip_gen: v7x
topology: tpu7x:2x2x1
jax: 0.10.0
libtpu: 0.0.40
codegen_flags: <defaults>
</compile_context>

<pallas_src>
import numpy as np
import jax
import jax.numpy as jnp
from jax.experimental import pallas as pl
from jax.experimental.pallas import tpu as pltpu


# ----------------------------------------------------------------------------
# Kernel 1: self.avg_pool(self.upsample(image))
# ----------------------------------------------------------------------------
def _upsample_avgpool_matrices(size, kernel, scale=7, lane=128):
    """Mixing matrix A with  A @ x == AvgPool1d(kernel)(UpsampleNearest(scale)(x)).

    Returns (A [Ho, H] bf16, zero-padded A^T [H, Ho_pad] bf16, Ho, Ho_pad) where
    Ho_pad is Ho rounded up to a multiple of 128 (lane-dense output stores)."""
    up = size * scale
    out = up // kernel                       # AvgPool2d default: stride=kernel, floor
    A = np.zeros((out, size), np.float32)
    for o in range(out):
        for d in range(kernel):
            A[o, (o * kernel + d) // scale] += 1.0 / kernel
    out_pad = ((out + lane - 1) // lane) * lane
    A_T = np.zeros((size, out_pad), np.float32)
    A_T[:, :out] = A.T
    return (jnp.asarray(A, jnp.bfloat16), jnp.asarray(A_T, jnp.bfloat16),
            out, out_pad)


def _pool_kernel(a_ref, at_ref, x_ref, o_ref):
    # a_ref: (Ho, H) bf16, at_ref: (W, Ho_pad) bf16 (zero-padded A^T),
    # x_ref: (C, H, W) image block, o_ref: (C, Ho, Ho_pad).
    C, H, W = x_ref.shape
    x = x_ref[...].astype(jnp.bfloat16)                       # bf16 MXU operands
    # Contract W for all channels at once: (C*H, W) @ (W, Ho_pad), f32 accumulate.
    t = jnp.dot(x.reshape(C * H, W), at_ref[...],
                preferred_element_type=jnp.float32)
    t = t.reshape(C, H, -1).astype(jnp.bfloat16)
    # Contract H per channel (C is small, e.g. RGB -> 3 unrolled matmuls).
    a = a_ref[...]
    for c in range(C):
        o_ref[c, :, :] = jnp.dot(
            a, t[c], preferred_element_type=jnp.float32).astype(o_ref.dtype)


def upsample_avgpool(image, kernel_size):
    """torch.nn.Upsample(scale_factor=7) followed by AvgPool2d(kernel_size)."""
    B, C, H, W = image.shape
    assert H == W, "square images assumed (StyleGAN output)"
    A, A_T, Ho, Ho_pad = _upsample_avgpool_matrices(H, kernel_size)
    out_padded = pl.pallas_call(
        _pool_kernel,
        out_shape=jax.ShapeDtypeStruct((B, C, Ho, Ho_pad), image.dtype),
        grid=(B,),
        in_specs=[
            pl.BlockSpec((Ho, H), lambda b: (0, 0)),          # resident across grid
            pl.BlockSpec((H, Ho_pad), lambda b: (0, 0)),      # resident across grid
            pl.BlockSpec((None, C, H, W), lambda b: (b, 0, 0, 0)),
        ],
        out_specs=pl.BlockSpec((None, C, Ho, Ho_pad), lambda b: (b, 0, 0, 0)),
        compiler_params=pltpu.CompilerParams(
            dimension_semantics=("parallel",)),               # shards grid over TCs on v7x
    )(A, A_T, image)
    # Drop the lane padding (in-kernel stores were lane-dense at width Ho_pad).
    return out_padded[..., :Ho]


# ----------------------------------------------------------------------------
# Kernel 2: normalize features + scaled similarity matmul + 1 - logits/100
# ----------------------------------------------------------------------------
def _clip_similarity_kernel(scale_ref, img_ref, txt_ref, out_ref):
    img = img_ref[...].astype(jnp.float32)
    txt = txt_ref[...].astype(jnp.float32)
    # x / x.norm(dim=-1, keepdim=True)  via rsqrt (EUP) instead of sqrt + divide.
    img = img * jax.lax.rsqrt(jnp.sum(img * img, axis=-1, keepdims=True))
    txt = txt * jax.lax.rsqrt(jnp.sum(txt * txt, axis=-1, keepdims=True))
    # logits_per_image = logit_scale.exp() * img_n @ txt_n.T ; fold the /100 in.
    logits = jax.lax.dot_general(
        img.astype(jnp.bfloat16), txt.astype(jnp.bfloat16),
        (((1,), (1,)), ((), ())), preferred_element_type=jnp.float32)    # (B, B)
    scale = jnp.exp(jnp.full((1, 1), scale_ref[0], jnp.float32)) * 0.01  # EUP exp
    out_ref[...] = (1.0 - scale * logits).astype(out_ref.dtype)


def clip_similarity(image_features, text_features, logit_scale):
    """similarity = 1 - logit_scale.exp() * img_n @ txt_n.T / 100 (fp16 result)."""
    B = image_features.shape[0]
    # Features enter the kernel as bf16 (half the HBM bytes of the old f32
    # pre-cast); normalization runs in f32 in-kernel, the matmul in bf16 on MXU.
    # TODO(synk): torch computes this in float16; in-kernel f16 support is
    # TPU-generation dependent in Mosaic, so bf16 compute + a final fp16 cast is
    # used.  Whole-array blocks are fine at CLIP-scale B; tile with a
    # (B/128, B/128) parallel grid if the (B, B) logits ever outgrow VMEM.
    sim = pl.pallas_call(
        _clip_similarity_kernel,
        out_shape=jax.ShapeDtypeStruct((B, B), jnp.bfloat16),
        in_specs=[
            pl.BlockSpec(memory_space=pltpu.MemorySpace.SMEM),   # scalar logit_scale
            pl.BlockSpec(memory_space=pltpu.MemorySpace.VMEM),
            pl.BlockSpec(memory_space=pltpu.MemorySpace.VMEM),
        ],
        out_specs=pl.BlockSpec(memory_space=pltpu.MemorySpace.VMEM),
    )(logit_scale,
      image_features.astype(jnp.bfloat16),
      text_features.astype(jnp.bfloat16))
    # torch result dtype is float16 (fp16 features); no unclamped-scale clamp,
    # matching the reference forward exactly.
    return sim.astype(jnp.float16)


if __name__ == "__main__":
    key = jax.random.PRNGKey(0)
    k1, k2, k3, k4 = jax.random.split(key, 4)

    # Small, forward-consistent shapes.
    B, C, H = 2, 3, 16
    stylegan_size = 64                       # opts.stylegan_size -> kernel = 64//32 = 2
    kernel_size = stylegan_size // 32
    D = 64                                   # feature dim (real CLIP ViT-B/32: 512)
    audio_len = 32

    image = jax.random.normal(k1, (B, C, H, H), jnp.float32)
    audio = jax.random.normal(k2, (B, audio_len), jnp.float32)

    # image = self.avg_pool(self.upsample(image))   -- Pallas kernel 1
    pooled = upsample_avgpool(image, kernel_size)   # (B, C, 56, 56)

    # TODO(synk): CLIP ViT-B/32 encode_image and wav2clip.embed_audio are external
    # pretrained networks with no Pallas equivalent; deterministic linear
    # projections stand in for them (fp16 features, as in the torch reference).
    w_img = jax.random.normal(k3, (C * pooled.shape[-1] ** 2, D), jnp.float32) * 0.02
    w_aud = jax.random.normal(k4, (audio_len, D), jnp.float32) * 0.02
    image_features = (pooled.reshape(B, -1) @ w_img).astype(jnp.float16)
    text_features = (audio @ w_aud).astype(jnp.float16)

    # self.logit_scale = nn.Parameter(ones([]) * log(1/0.07))  -- deterministic init
    logit_scale = jnp.full((1,), np.log(1.0 / 0.07), jnp.float32)

    # similarity = 1 - logits_per_image / 100       -- Pallas kernel 2
    similarity = clip_similarity(image_features, text_features, logit_scale)
    jax.block_until_ready(similarity)
    assert similarity.shape == (B, B) and similarity.dtype == jnp.float16
    print("KERNEL_OK")
</pallas_src>

<mosaic_0001>
module attributes {stable_mosaic.version = 11 : i64} {
  func.func @_pool_kernel(%arg0: i32, %arg1: memref<56x16xbf16, #tpu.memory_space<vmem>>, %arg2: memref<16x128xbf16, #tpu.memory_space<vmem>>, %arg3: memref<1x3x16x16xf32, #tpu.memory_space<vmem>>, %arg4: memref<1x3x56x128xf32, #tpu.memory_space<vmem>>) attributes {dimension_semantics = [#tpu.dimension_semantics<parallel>], iteration_bounds = array<i64: 2>, scalar_prefetch = 0 : i64, scratch_operands = 0 : i64, tpu.core_type = #tpu.core_type<tc>, window_params = [{pipeline_mode = #tpu.pipeline_mode<synchronous>, transform_indices = @transform_0, window_bounds = array<i64: 56, 16>}, {pipeline_mode = #tpu.pipeline_mode<synchronous>, transform_indices = @transform_1, window_bounds = array<i64: 16, 128>}, {transform_indices = @transform_2, window_bounds = array<i64: 1, 3, 16, 16>}, {transform_indices = @transform_3, window_bounds = array<i64: 1, 3, 56, 128>}]} {
    %c0 = arith.constant 0 : index
    %c0_0 = arith.constant 0 : index
    %c0_1 = arith.constant 0 : index
    %c0_2 = arith.constant 0 : index
    %0 = vector.load %arg3[%c0, %c0_0, %c0_1, %c0_2] : memref<1x3x16x16xf32, #tpu.memory_space<vmem>>, vector<1x3x16x16xf32>
    %1 = vector.shape_cast %0 : vector<1x3x16x16xf32> to vector<3x16x16xf32>
    %2 = arith.truncf %1 : vector<3x16x16xf32> to vector<3x16x16xbf16>
    %3 = vector.shape_cast %2 : vector<3x16x16xbf16> to vector<48x16xbf16>
    %c0_3 = arith.constant 0 : index
    %c0_4 = arith.constant 0 : index
    %4 = vector.load %arg2[%c0_3, %c0_4] : memref<16x128xbf16, #tpu.memory_space<vmem>>, vector<16x128xbf16>
    %cst = arith.constant dense<0.000000e+00> : vector<48x128xf32>
    %5 = tpu.matmul %3, %4, %cst {dimension_numbers = #tpu.dot_dimension_numbers<[1], [0], [0], [1], [0, 0, 1, 1], [], []>} : vector<48x16xbf16>, vector<16x128xbf16>, vector<48x128xf32> -> vector<48x128xf32>
    %6 = vector.shape_cast %5 : vector<48x128xf32> to vector<3x16x128xf32>
    %7 = arith.truncf %6 : vector<3x16x128xf32> to vector<3x16x128xbf16>
    %c0_5 = arith.constant 0 : index
    %c0_6 = arith.constant 0 : index
    %8 = vector.load %arg1[%c0_5, %c0_6] : memref<56x16xbf16, #tpu.memory_space<vmem>>, vector<56x16xbf16>
    %9 = vector.extract_strided_slice %7 {offsets = [0, 0, 0], sizes = [1, 16, 128], strides = [1, 1, 1]} : vector<3x16x128xbf16> to vector<1x16x128xbf16>
    %10 = vector.shape_cast %9 : vector<1x16x128xbf16> to vector<16x128xbf16>
    %cst_7 = arith.constant dense<0.000000e+00> : vector<56x128xf32>
    %11 = tpu.matmul %8, %10, %cst_7 {dimension_numbers = #tpu.dot_dimension_numbers<[1], [0], [0], [1], [0, 0, 1, 1], [], []>} : vector<56x16xbf16>, vector<16x128xbf16>, vector<56x128xf32> -> vector<56x128xf32>
    %c0_8 = arith.constant 0 : index
    %c0_9 = arith.constant 0 : index
    %c0_10 = arith.constant 0 : index
    %c0_11 = arith.constant 0 : index
    %12 = vector.load %arg4[%c0_8, %c0_9, %c0_10, %c0_11] : memref<1x3x56x128xf32, #tpu.memory_space<vmem>>, vector<1x1x56x128xf32>
    %13 = vector.shape_cast %12 : vector<1x1x56x128xf32> to vector<56x128xf32>
    %14 = vector.shape_cast %11 : vector<56x128xf32> to vector<1x1x56x128xf32>
    tpu.vector_store %arg4[%c0_8, %c0_9, %c0_10, %c0_11], %14 {strides = array<i32>} : memref<1x3x56x128xf32, #tpu.memory_space<vmem>>, vector<1x1x56x128xf32>,
    %15 = vector.extract_strided_slice %7 {offsets = [1, 0, 0], sizes = [1, 16, 128], strides = [1, 1, 1]} : vector<3x16x128xbf16> to vector<1x16x128xbf16>
    %16 = vector.shape_cast %15 : vector<1x16x128xbf16> to vector<16x128xbf16>
    %cst_12 = arith.constant dense<0.000000e+00> : vector<56x128xf32>
    %17 = tpu.matmul %8, %16, %cst_12 {dimension_numbers = #tpu.dot_dimension_numbers<[1], [0], [0], [1], [0, 0, 1, 1], [], []>} : vector<56x16xbf16>, vector<16x128xbf16>, vector<56x128xf32> -> vector<56x128xf32>
    %c0_13 = arith.constant 0 : index
    %c1 = arith.constant 1 : index
    %c0_14 = arith.constant 0 : index
    %c0_15 = arith.constant 0 : index
    %18 = vector.load %arg4[%c0_13, %c1, %c0_14, %c0_15] : memref<1x3x56x128xf32, #tpu.memory_space<vmem>>, vector<1x1x56x128xf32>
    %19 = vector.shape_cast %18 : vector<1x1x56x128xf32> to vector<56x128xf32>
    %20 = vector.shape_cast %17 : vector<56x128xf32> to vector<1x1x56x128xf32>
    tpu.vector_store %arg4[%c0_13, %c1, %c0_14, %c0_15], %20 {strides = array<i32>} : memref<1x3x56x128xf32, #tpu.memory_space<vmem>>, vector<1x1x56x128xf32>,
    %21 = vector.extract_strided_slice %7 {offsets = [2, 0, 0], sizes = [1, 16, 128], strides = [1, 1, 1]} : vector<3x16x128xbf16> to vector<1x16x128xbf16>
    %22 = vector.shape_cast %21 : vector<1x16x128xbf16> to vector<16x128xbf16>
    %cst_16 = arith.constant dense<0.000000e+00> : vector<56x128xf32>
    %23 = tpu.matmul %8, %22, %cst_16 {dimension_numbers = #tpu.dot_dimension_numbers<[1], [0], [0], [1], [0, 0, 1, 1], [], []>} : vector<56x16xbf16>, vector<16x128xbf16>, vector<56x128xf32> -> vector<56x128xf32>
    %c0_17 = arith.constant 0 : index
    %c2 = arith.constant 2 : index
    %c0_18 = arith.constant 0 : index
    %c0_19 = arith.constant 0 : index
    %24 = vector.load %arg4[%c0_17, %c2, %c0_18, %c0_19] : memref<1x3x56x128xf32, #tpu.memory_space<vmem>>, vector<1x1x56x128xf32>
    %25 = vector.shape_cast %24 : vector<1x1x56x128xf32> to vector<56x128xf32>
    %26 = vector.shape_cast %23 : vector<56x128xf32> to vector<1x1x56x128xf32>
    tpu.vector_store %arg4[%c0_17, %c2, %c0_18, %c0_19], %26 {strides = array<i32>} : memref<1x3x56x128xf32, #tpu.memory_space<vmem>>, vector<1x1x56x128xf32>,
    return
  }
  func.func @transform_0(%arg0: i32) -> (i32, i32) {
    %c0_i32 = arith.constant 0 : i32
    %c0_i32_0 = arith.constant 0 : i32
    %c0_i32_1 = arith.constant 0 : i32
    return %c0_i32, %c0_i32_0 : i32, i32
  }
  func.func @transform_1(%arg0: i32) -> (i32, i32) {
    %c0_i32 = arith.constant 0 : i32
    %c0_i32_0 = arith.constant 0 : i32
    %c0_i32_1 = arith.constant 0 : i32
    return %c0_i32, %c0_i32_0 : i32, i32
  }
  func.func @transform_2(%arg0: i32) -> (i32, i32, i32, i32) {
    %c0_i32 = arith.constant 0 : i32
    %c0_i32_0 = arith.constant 0 : i32
    %c0_i32_1 = arith.constant 0 : i32
    %c0_i32_2 = arith.constant 0 : i32
    return %arg0, %c0_i32, %c0_i32_0, %c0_i32_1 : i32, i32, i32, i32
  }
  func.func @transform_3(%arg0: i32) -> (i32, i32, i32, i32) {
    %c0_i32 = arith.constant 0 : i32
    %c0_i32_0 = arith.constant 0 : i32
    %c0_i32_1 = arith.constant 0 : i32
    %c0_i32_2 = arith.constant 0 : i32
    return %arg0, %c0_i32, %c0_i32_0, %c0_i32_1 : i32, i32, i32, i32
  }
}

</mosaic_0001>

<bundles_post_ra>
// kernel: tpu_custom_call.1
= control target key start
LH: loop header
LB: loop body
LE: loop exit
PB: predicated region body
PF: predicated region fallthrough
CT: control target
= control target key end

     0   :  { %8 = vsyncpa [#allocation3], 0  ;;  %s1120_s0 = inlined_call_operand.vmem [shape: bf16[56,16], index: 0, kind: input, shape index: {}]   ;;  %s1121_s1 = inlined_call_operand.vmem [shape: bf16[16,128], index: 1, kind: input, shape index: {}]   ;;  %s1122_s2 = inlined_call_operand.hbm [shape: f32[2,3,16,16], index: 2, kind: input, shape index: {}]   ;;  %s1123_s3 = inlined_call_operand.hbm [shape: f32[2,3,56,128], index: 3, kind: output, shape index: {}]  }
   0x1   :  { %10 = vsyncpa [#allocation3 + $0x1], 0 }
   0x2   :  { %11 = vsyncpa [#allocation4], 0 }
   0x3   :  { %13 = vsyncpa [#allocation4 + $0x1], 0  ;;  %s909_s12 = smov 0   ;;  %s911_s13 = smov 0  }
   0x4   :  { %s913_s14 = smov 0   ;;  %s915_s15 = smov 0  }
   0x5 LB: > { %s930_s16 = sadd.s32 4294967295, %s879_s15   ;;  %s616_s17 = sadd.s32 4294967294, %s879_s15   ;;  %s879_s15 = sphi %s915_s15, %s1135_s15   ;;  %s875_s14 = sphi %s913_s14, %s1134_s14   ;;  %s871_s13 = sphi %s911_s13, %s1133_s13   ;;  %s867_s12 = sphi %s909_s12, %s1132_s12  }
   0x6   : > { %s934_s18 = sadd.s32 1, %s879_s15   ;;  %s68_s19 = sadd.s32 1, %s875_s14 }
   0x7   : > { %s65_s20 = ssub.s32 %s879_s15, %s934_s18  ;;  %p75_p0 = scmp.ne.s32.totalorder %s875_s14, %s871_s13 }
   0x8   : > { %p66_p1 = scmp.eq.s32.totalorder %s65_s20, 0  ;;  %p76_p2 = scmp.eq.s32.totalorder %s879_s15, 0 }
   0x9   : > { %p81_p3 = scmp.ne.s32.totalorder %s871_s13, %s867_s12  ;;  %p82_p4 = scmp.eq.s32.totalorder %s930_s16, 0 }
   0xa   : > { %s946_s21 = scalar_select %p66_p1, %s875_s14, %s68_s19  }
   0xb   : > { %p77_p5 = por %p76_p2, %p75_p0  ;;  %p948_p6 = por %p82_p4, %p81_p3 }
   0xc   : > { %p105_p7 = scmp.eq.s32.totalorder %s930_s16, 1  ;;  %p111_p8 = scmp.eq.s32.totalorder %s616_s17, 1 }
   0xd   : > { %p738_p10 = scmp.lt.s32.totalorder %s879_s15, 2  ;;  %s137_s25 = sand.u32 1, %s875_s14  }
   0xe   : > { %p955_p11 = por %p105_p7, %p75_p0  ;;  %p959_p12 = por %p111_p8, %p81_p3 }
   0xf   : > { %s722_s26 = smul.u32 768, %s879_s15  ;;  %p970_p13 = pnand %p738_p10, %p77_p5 }
  0x10   : > { %s1126_s23 = scalar_select %p955_p11, 1, 0 }
  0x11   : > { %s1127_s24 = scalar_select %p959_p12, 1, 0 }
  0x12   : > { %s721_s27 = smul.u32 48, %s137_s25  ;;  %s968_s30 = scalar_lea.hbm %s1122_s2, %s722_s26 }
  0x13   : > { %s976_s7 = scalar_lea.sflag [#allocation3], %s137_s25  ;;  %s783_s8 = scalar_lea.hbm %s968_s30, 768 }
  0x14   : > { %s141_s5 = scalar_lea.vmem [#allocation2], %s721_s27  ;;  %p784_p0 = scmp.ne.s32.totalorder %s968_s30, %s783_s8 }
  0x15   : > { %s148_s6 = sshll.u32 %s141_s5, 4  ;;  %p785_p1 = pneg %p970_p13  ;;  %s974_s6 = int_to_ptr.vmem [resolvable:$true] %s148_s6 }
  0x16   : > { %s788_s11 = scalar_lea.hbm %s1122_s2, 1536  ;;  %p789_p4 = scmp.lt.u32.totalorder %s968_s30, %s1122_s2 }
  0x17   : > { %p786_p2 = pnand %p785_p1, %p784_p0  ;;  %p790_p5 = scmp.lt.u32.totalorder %s788_s11, %s783_s8 }
  0x18   : > { %p792_p8 = scmp.lt.u32.totalorder %s783_s8, %s968_s30 }
  0x19   : > { %p787_p3 = pneg %p786_p2  ;;  %p791_p7 = por %p790_p5, %p789_p4 }
  0x1b   : > { %p793_p10 = por %p792_p8, %p791_p7 }
  0x1d   : > { %p794_p9 = pnand %p793_p10, %p787_p3 }
  0x1f   : > { %797 = shalt.err (!%p794_p9)
}
  0x20   : > { %s798_s20 = scalar_lea.vmem %s974_s6, 768  ;;  %s881_s25 = smov [#allocation2]  }
  0x21   : > { %p799_p0 = scmp.ne.s32.totalorder %s974_s6, %s798_s20  ;;  %s803_s26 = sshll.u32 %s881_s25, 4  ;;  %s804_s26 = int_to_ptr.vmem [resolvable:$false] %s803_s26 }
  0x22   : > { %s805_s27 = scalar_lea.vmem %s804_s26, 1536  ;;  %p806_p11 = scmp.lt.s32.totalorder %s974_s6, %s804_s26 }
  0x23   : > { %p801_p2 = pnand %p799_p0, %p785_p1  ;;  %p807_p4 = scmp.lt.s32.totalorder %s805_s27, %s798_s20 }
  0x25   : > { %p802_p12 = pneg %p801_p2  ;;  %p808_p5 = por %p807_p4, %p806_p11 }
  0x27   : > { %p809_p7 = pnand %p808_p5, %p802_p12 }
  0x29   : > { %812 = shalt.err (!%p809_p7)
}
  0x2a   : > { %s882_s28 = smov 128   ;;  %s883_s29 = smov 8  }
  0x2b   : > { %733 = dma.hbm_to_vmem [thread:$0]  (!%p970_p13), %s968_s30, 768, %s974_s6, %s976_s7, %s882_s28, %s882_s28, %s883_s29  }
  0x2c   : > { %p620_p9 = scmp.ge.s32.totalorder %s879_s15, 1  ;;  %p156_p1 = scmp.lt.s32.totalorder %s879_s15, 3 }
  0x2e   : > { %p157_p3 = pnand %p620_p9, %p156_p1 }
  0x2f   : > { %s1007_s5 = sand.u32 (!%p157_p3), 1, %s871_s13  }
  0x30   : > { %160 = sbr.rel (%p157_p3) target bundleno = 535 (0x217), region = 32  ;;  %s163_s9 = scalar_lea.sflag (!%p157_p3), [#allocation3], %s1007_s5 }
  0x31   : > { %s723_s8 = smul.u32 (!%p157_p3), 48, %s1007_s5 }
  0x33   : > { %s166_s10 = scalar_lea.vmem (!%p157_p3), [#allocation2], %s723_s8 }
  0x37   : > { %858 = dma.done.wait (%p948_p6), %s163_s9, 768  }
  0x38   : > { %860 = vsyncadd (%p948_p6), %s163_s9, 4294966528  ;;  %v884_v0 = vmov 0.0   ;;  %vm885_vm0 = vmmov 0   ;;  %v778_v1 = vld [vmem:[%s1121_s1] sm:$0xff]   ;;  %v191_v3 = vld [vmem:[%s166_s10 + $0x8] sm:$0xff]  ;;  %vm207_vm1 = vcmask 130048  }
  0x39   : > { %677 = vmatprep.subr.bf16.mxu0 %v884_v0  ;;  %679 = vmatprep.mubr.msk.bf16.mxu0 %vm885_vm0, %v884_v0  ;;  %v190_v2 = vld [vmem:[%s166_s10] sm:$0xff]  ;;  %v192_v5 = vld [vmem:[%s166_s10 + $0x10] sm:$0xff]  ;;  %v193_v6 = vld [vmem:[%s166_s10 + $0x18] sm:$0xff]  ;;  %s724_s26 = smul.u32 168, %s1007_s5  ;;  %p1129_p11 = scmp.ne.s32.totalorder %s1126_s23, 0 }
  0x3a   : > { %678 = vmatpush3.bf16.msra.mxu0 %v778_v1  ;;  %v196_v4 = vpack.c.bf16 %v191_v3, %v190_v2  ;;  %v197_v7 = vpack.c.bf16 %v193_v6, %v192_v5  ;;  %v194_v8 = vld [vmem:[%s166_s10 + $0x20] sm:$0xff]  ;;  %v195_v9 = vld [vmem:[%s166_s10 + $0x28] sm:$0xff]  ;;  %s725_s28 = smul.u32 2688, %s930_s16  ;;  %s530_s16 = scalar_lea.sflag [#allocation4], %s1007_s5 }
  0x3b   : > { %v198_v10 = vpack.c.bf16 %v195_v9, %v194_v8  ;;  %v779_v11 = vld [vmem:[%s1120_s0] sm:$0xff]   ;;  %v780_v17 = vld [vmem:[%s1120_s0 + $0x8] sm:$0xff]   ;;  %v781_v18 = vld [vmem:[%s1120_s0 + $0x10] sm:$0xff]   ;;  %s1046_s27 = scalar_lea.vmem [#allocation5], %s724_s26  ;;  %s886_s4 = smov [#allocation5]  }
  0x3c   : > { %693 = vmatprep.mubr.msk.bf16.mxu1 %vm207_vm1, %v779_v11  ;;  %v782_v24 = vld [vmem:[%s1120_s0 + $0x18] ss:$0 sps:$4 sm:$0xff]   ;;  %s543_s29 = sshll.u32 %s1046_s27, 4  ;;  %s1070_s10 = scalar_lea.hbm %s1123_s3, %s725_s28  ;;  %s1072_s29 = int_to_ptr.vmem [resolvable:$true] %s543_s29 }
  0x3d   : > { %680 = vmatmul.mubr.msk.bf16.vlgmr.msra.gmra.mrb[0].mxu0 %vm207_vm1, %v196_v4  ;;  %s813_s30 = scalar_lea.vmem %s1072_s29, 2688  ;;  %s817_s22 = sshll.u32 %s886_s4, 4  ;;  %s818_s22 = int_to_ptr.vmem [resolvable:$false] %s817_s22 }
  0x3e   : > { %683 = vmatprep.mubr.msk.bf16.mxu0 %vm885_vm0, %v884_v0  ;;  %p814_p6 = scmp.ne.s32.totalorder %s1072_s29, %s813_s30  ;;  %s819_s6 = scalar_lea.vmem %s818_s22, 5376 }
  0x3f   : > { %p820_p8 = scmp.lt.s32.totalorder %s1072_s29, %s818_s22  ;;  %p821_p10 = scmp.lt.s32.totalorder %s819_s6, %s813_s30 }
  0x40   : > { %p815_p12 = pnand %p814_p6, %p1129_p11 }
  0x41   : > { %p822_p0 = por %p821_p10, %p820_p8 }
  0x42   : > { %p816_p13 = pneg %p815_p12 }
  0x44   : > { %p823_p2 = pnand %p822_p0, %p816_p13 }
  0x45   : > { %684 = vmatmul.mubr.msk.bf16.gmra.mrb[4].mxu0 %vm207_vm1, %v197_v7 }
  0x46   : > { %687 = vmatprep.mubr.msk.bf16.mxu0 %vm885_vm0, %v884_v0 }
  0x4d   : > { %688 = vmatmul.mubr.msk.bf16.gmra.mrb[8].mxu0 %vm207_vm1, %v198_v10 }
  0x4e   : > { %713 = vmatprep.mubr.msk.bf16.mxu0 %vm207_vm1, %v779_v11 }
 0x110   : > { %v251_v12 = vpop.f32.mrb[0].mxu0 }
 0x111   : > { %v681_v13 = vpop.f32.mrb[1].mxu0 }
 0x112   : > { %v254_v14 = vpop.f32.mrb[2].mxu0 }
 0x113   : > { %v274_v15 = vpack.c.bf16 %v254_v14, %v251_v12  ;;  %v682_v16 = vpop.f32.mrb[3].mxu0 }
 0x115   : > { %691 = vmatprep.subr.bf16.mxu1 %v274_v15 }
 0x116   : > { %692 = vmatpush3.bf16.msra.mxu1 %v274_v15 }
 0x118   : > { %v259_v19 = vpop.f32.mrb[4].mxu0 }
 0x119   : > { %v685_v20 = vpop.f32.mrb[5].mxu0  ;;  %694 = vmatmul.mubr.msk.bf16.vlgmr.msra.gmra.mrb[0].mxu1 %vm207_vm1, %v780_v17 }
 0x11a   : > { %v262_v21 = vpop.f32.mrb[6].mxu0  ;;  %697 = vmatprep.mubr.msk.bf16.mxu1 %vm207_vm1, %v781_v18 }
 0x11b   : > { %v275_v22 = vpack.c.bf16 %v262_v21, %v259_v19  ;;  %v686_v23 = vpop.f32.mrb[7].mxu0 }
 0x11d   : > { %701 = vmatprep.subr.bf16.mxu1 %v275_v22 }
 0x11e   : > { %702 = vmatpush3.bf16.msra.mxu1 %v275_v22 }
 0x120   : > { %v267_v25 = vpop.f32.mrb[8].mxu0 }
 0x121   : > { %v689_v26 = vpop.f32.mrb[9].mxu0  ;;  %698 = vmatmul.mubr.msk.bf16.gmra.mrb[4].mxu1 %vm207_vm1, %v782_v24 }
 0x122   : > { %v270_v27 = vpop.f32.mrb[10].mxu0  ;;  %703 = vmatprep.mubr.msk.bf16.mxu1 %vm207_vm1, %v779_v11 }
 0x123   : > { %v276_v28 = vpack.c.bf16 %v270_v27, %v267_v25  ;;  %v690_v29 = vpop.f32.mrb[11].mxu0 }
 0x125   : > { %711 = vmatprep.subr.bf16.mxu0 %v276_v28 }
 0x126   : > { %712 = vmatpush3.bf16.msra.mxu0 %v276_v28 }
 0x129   : > { %704 = vmatmul.mubr.msk.bf16.vlgmr.msra.gmra.mrb[8].mxu1 %vm207_vm1, %v780_v17  ;;  %714 = vmatmul.mubr.msk.bf16.vlgmr.msra.gmra.mrb[12].mxu0 %vm207_vm1, %v780_v17 }
 0x12a   : > { %707 = vmatprep.mubr.msk.bf16.mxu1 %vm207_vm1, %v781_v18  ;;  %717 = vmatprep.mubr.msk.bf16.mxu0 %vm207_vm1, %v781_v18 }
 0x131   : > { %708 = vmatmul.mubr.msk.bf16.gmra.mrb[12].mxu1 %vm207_vm1, %v782_v24  ;;  %718 = vmatmul.mubr.msk.bf16.gmra.mrb[16].mxu0 %vm207_vm1, %v782_v24 }
 0x1ec   : > { %v695_v30 = vpop.f32.mrb[0].mxu1 }
 0x1ed   : > { %380 = vst [vmem:[%s1046_s27 + $0x10] sm:$0xff] %v695_v30  ;;  %v348_v31 = vpop.f32.mrb[1].mxu1 }
 0x1ee   : > { %378 = vst [vmem:[%s1046_s27] sm:$0xff] %v348_v31  ;;  %v696_v32 = vpop.f32.mrb[2].mxu1 }
 0x1ef   : > { %381 = vst [vmem:[%s1046_s27 + $0x18] sm:$0xff] %v696_v32  ;;  %v351_v33 = vpop.f32.mrb[3].mxu1 }
 0x1f0   : > { %379 = vst [vmem:[%s1046_s27 + $0x8] sm:$0xff] %v351_v33 }
 0x1f4   : > { %v699_v34 = vpop.f32.mrb[4].mxu1 }
 0x1f5   : > { %384 = vst [vmem:[%s1046_s27 + $0x30] sm:$0xff] %v699_v34  ;;  %v364_v35 = vpop.f32.mrb[5].mxu1 }
 0x1f6   : > { %382 = vst [vmem:[%s1046_s27 + $0x20] sm:$0xff] %v364_v35  ;;  %v700_v36 = vpop.f32.mrb[6].mxu1 }
 0x1f7   : > { %v367_v37 = vpop.f32.mrb[7].mxu1 }
 0x1f8   : > { %383 = vst [vmem:[%s1046_s27 + $0x28] sm:$0xff] %v367_v37 }
 0x1fc   : > { %v705_v38 = vpop.f32.mrb[8].mxu1  ;;  %v715_v39 = vpop.f32.mrb[12].mxu0 }
 0x1fd   : > { %639 = vst [vmem:[%s1046_s27 + $0x48] sm:$0xff] %v705_v38  ;;  %650 = vst [vmem:[%s1046_s27 + $0x80] sm:$0xff] %v715_v39  ;;  %v419_v40 = vpop.f32.mrb[9].mxu1  ;;  %v491_v41 = vpop.f32.mrb[13].mxu0 }
 0x1fe   : > { %637 = vst [vmem:[%s1046_s27 + $0x38] sm:$0xff] %v419_v40  ;;  %648 = vst [vmem:[%s1046_s27 + $0x70] sm:$0xff] %v491_v41  ;;  %v706_v42 = vpop.f32.mrb[10].mxu1  ;;  %v716_v43 = vpop.f32.mrb[14].mxu0 }
 0x1ff   : > { %640 = vst [vmem:[%s1046_s27 + $0x50] sm:$0xff] %v706_v42  ;;  %651 = vst [vmem:[%s1046_s27 + $0x88] sm:$0xff] %v716_v43  ;;  %v422_v44 = vpop.f32.mrb[11].mxu1  ;;  %v494_v45 = vpop.f32.mrb[15].mxu0 }
 0x200   : > { %638 = vst [vmem:[%s1046_s27 + $0x40] sm:$0xff] %v422_v44  ;;  %649 = vst [vmem:[%s1046_s27 + $0x78] sm:$0xff] %v494_v45 }
 0x204   : > { %v709_v46 = vpop.f32.mrb[12].mxu1  ;;  %v719_v47 = vpop.f32.mrb[16].mxu0 }
 0x205   : > { %643 = vst [vmem:[%s1046_s27 + $0x68] sm:$0xff] %v709_v46  ;;  %654 = vst [vmem:[%s1046_s27 + $0xa0] sm:$0xff] %v719_v47  ;;  %v435_v48 = vpop.f32.mrb[13].mxu1  ;;  %v507_v49 = vpop.f32.mrb[17].mxu0 }
 0x206   : > { %641 = vst [vmem:[%s1046_s27 + $0x58] sm:$0xff] %v435_v48  ;;  %652 = vst [vmem:[%s1046_s27 + $0x90] sm:$0xff] %v507_v49  ;;  %v710_v50 = vpop.f32.mrb[14].mxu1  ;;  %v720_v51 = vpop.f32.mrb[18].mxu0 }
 0x207   : > { %v438_v52 = vpop.f32.mrb[15].mxu1  ;;  %v510_v53 = vpop.f32.mrb[19].mxu0 }
 0x208   : > { %642 = vst [vmem:[%s1046_s27 + $0x60] sm:$0xff] %v438_v52  ;;  %653 = vst [vmem:[%s1046_s27 + $0x98] sm:$0xff] %v510_v53 }
 0x209   : > { %826 = shalt.err (!%p823_p2)
}
 0x20a   : > { %s827_s7 = scalar_lea.hbm %s1070_s10, 2688  ;;  %s831_s19 = scalar_lea.hbm %s1123_s3, 5376 }
 0x20b   : > { %p828_p4 = scmp.ne.s32.totalorder %s1070_s10, %s827_s7  ;;  %p832_p9 = scmp.lt.u32.totalorder %s1070_s10, %s1123_s3 }
 0x20c   : > { %p833_p1 = scmp.lt.u32.totalorder %s831_s19, %s827_s7  ;;  %p835_p6 = scmp.lt.u32.totalorder %s827_s7, %s1070_s10 }
 0x20d   : > { %p829_p5 = pnand %p828_p4, %p1129_p11 }
 0x20e   : > { %p834_p3 = por %p833_p1, %p832_p9 }
 0x20f   : > { %p830_p7 = pneg %p829_p5 }
 0x210   : > { %p836_p12 = por %p835_p6, %p834_p3 }
 0x212   : > { %p837_p13 = pnand %p836_p12, %p830_p7 }
 0x214   : > { %840 = shalt.err (!%p837_p13)
}
 0x215   : > { %s887_s26 = smov 128   ;;  %s888_s27 = smov 8  }
 0x216   : > { %728 = dma.vmem_to_hbm [thread:$0]  (%p1129_p11), %s1072_s29, 2688, %s1070_s10, %s530_s16, %s887_s26, %s887_s26, %s888_s27  }
 0x217 PF: > { %s558_s28 = sand.u32 1, %s867_s12   ;;  %p1130_p8 = scmp.ne.s32.totalorder %s1127_s24, 0 }
 0x218   : > { %p1131_p10 = scmp.ge.s32.totalorder %s879_s15, 2  ;;  %s559_s8 = scalar_lea.sflag [#allocation4], %s558_s28 }
 0x21a   : > { %p735_p0 = pnand %p1131_p10, %p1130_p8 }
 0x21c   : > { %862 = dma.done.wait (!%p735_p0), %s559_s8, 2688  }
 0x21d   : > { %864 = vsyncadd (!%p735_p0), %s559_s8, 4294964608  ;;  %p16_p2 = scmp.ge.s32.totalorder %s934_s18, 4   ;;  %s1132_s12 = smov %s871_s13 }
 0x21e   : > { %s1133_s13 = smov %s875_s14  ;;  %s1134_s14 = smov %s946_s21 }
 0x21f   : > { %s1135_s15 = smov %s934_s18  ;;  %18 = sbr.rel (!%p16_p2) target bundleno = 5 (0x5), region = 79 }
 0x226   :  { %564 = vsyncpa [#allocation3], 1 }
 0x227   :  { %566 = vsyncpa [#allocation3 + $0x1], 1 }
 0x228   :  { %567 = vsyncpa [#allocation4], 1 }
 0x229   :  { %569 = vsyncpa [#allocation4 + $0x1], 1 }

</bundles_post_ra>
